<compile_context>
chip_gen: v5e
topology: v5e:2x2
jax: 0.10.0
libtpu: 0.0.40
codegen_flags: <defaults>
</compile_context>

<pallas_src>
import jax
import jax.numpy as jnp
from jax.experimental import pallas as pl
from jax.experimental.pallas import tpu as pltpu

LANE = 128


def _sin_kernel(x_ref, o_ref):
    # Elementwise sin on the whole VMEM tile (EUP work, HBM-BW bound).
    o_ref[...] = jnp.sin(x_ref[...])


def _round_up(v: int, m: int) -> int:
    return ((v + m - 1) // m) * m


def _sublane_multiple(dtype) -> int:
    """Minimum sublane pack for the dtype: 8 (32-bit), 16 (16-bit), 32 (8-bit)."""
    itemsize = jnp.dtype(dtype).itemsize
    if itemsize >= 4:
        return 8
    if itemsize == 2:
        return 16
    return 32


def sin_act(x: jax.Array, *, tile_rows: int = 4096) -> jax.Array:
    """Elementwise sin matching torch.sin(x) (shape & dtype preserved)."""
    orig_shape = x.shape
    total = x.size
    if total == 0:
        return x

    sub = _sublane_multiple(x.dtype)

    # Lane-dense 2-D view.  Only the flat length is padded (to a multiple of
    # 128); the ragged row remainder is handled by the cdiv grid below.
    x_flat = jnp.ravel(x)
    padded = _round_up(total, LANE)
    needs_pad = padded != total
    if needs_pad:
        x_flat = jnp.pad(x_flat, (0, padded - total))
    rows = padded // LANE
    x2d = x_flat.reshape(rows, LANE)

    # Large tile, multiple of the dtype's sublane pack, capped near the
    # actual row count so tiny inputs don't over-allocate VMEM.
    tr = max(sub, min(_round_up(tile_rows, sub), _round_up(rows, sub)))

    grid = (pl.cdiv(rows, tr),)

    out2d = pl.pallas_call(
        _sin_kernel,
        out_shape=jax.ShapeDtypeStruct((rows, LANE), x2d.dtype),
        grid_spec=pltpu.PrefetchScalarGridSpec(
            num_scalar_prefetch=0,
            grid=grid,
            in_specs=[pl.BlockSpec((tr, LANE), lambda i: (i, 0))],
            out_specs=pl.BlockSpec((tr, LANE), lambda i: (i, 0)),
        ),
        compiler_params=pltpu.CompilerParams(
            dimension_semantics=("parallel",),
            vmem_limit_bytes=64 << 20,  # headroom for the 2 MiB double-buffered tiles
        ),
    )(x2d)

    if needs_pad:
        # Extra slice only when the element count is not a multiple of 128
        # (zero padding is harmless: sin(0) = 0).
        return out2d.reshape(-1)[:total].reshape(orig_shape)
    return out2d.reshape(orig_shape)


if __name__ == "__main__":
    key = jax.random.PRNGKey(0)

    # NCHW activation-like input (lane-aligned path: 2*4*16*16 = 2048 = 16*128).
    x = jax.random.normal(key, (2, 4, 16, 16), dtype=jnp.float32)
    y = sin_act(x)
    jax.block_until_ready(y)
    ref = jnp.sin(x)
    assert y.shape == x.shape and y.dtype == x.dtype
    assert jnp.allclose(y, ref, atol=1e-6, rtol=1e-6)

    # Ragged size exercising the pad + cdiv-grid path.
    x2 = jax.random.normal(jax.random.PRNGKey(1), (3, 5, 7, 11), dtype=jnp.float32)
    y2 = sin_act(x2)
    jax.block_until_ready(y2)
    assert y2.shape == x2.shape and y2.dtype == x2.dtype
    assert jnp.allclose(y2, jnp.sin(x2), atol=1e-6, rtol=1e-6)

    # bf16 path (16-row sublane pack).
    x3 = jax.random.normal(jax.random.PRNGKey(2), (2, 4, 16, 16), dtype=jnp.bfloat16)
    y3 = sin_act(x3)
    jax.block_until_ready(y3)
    assert y3.shape == x3.shape and y3.dtype == x3.dtype
    assert jnp.allclose(y3.astype(jnp.float32), jnp.sin(x3.astype(jnp.float32)),
                        atol=1e-2, rtol=1e-2)

    print("KERNEL_OK")
</pallas_src>

<mosaic_0001>
module attributes {stable_mosaic.version = 11 : i64} {
  func.func @_sin_kernel(%arg0: i32, %arg1: memref<16x128xf32, #tpu.memory_space<vmem>>, %arg2: memref<16x128xf32, #tpu.memory_space<vmem>>) attributes {dimension_semantics = [#tpu.dimension_semantics<parallel>], iteration_bounds = array<i64: 1>, scalar_prefetch = 0 : i64, scratch_operands = 0 : i64, tpu.core_type = #tpu.core_type<tc>, window_params = [{transform_indices = @transform_0, window_bounds = array<i64: 16, 128>}, {transform_indices = @transform_1, window_bounds = array<i64: 16, 128>}]} {
    %c0 = arith.constant 0 : index
    %c0_0 = arith.constant 0 : index
    %0 = vector.load %arg1[%c0, %c0_0] : memref<16x128xf32, #tpu.memory_space<vmem>>, vector<16x128xf32>
    %1 = math.sin %0 : vector<16x128xf32>
    %c0_1 = arith.constant 0 : index
    %c0_2 = arith.constant 0 : index
    %2 = vector.load %arg2[%c0_1, %c0_2] : memref<16x128xf32, #tpu.memory_space<vmem>>, vector<16x128xf32>
    tpu.vector_store %arg2[%c0_1, %c0_2], %1 {strides = array<i32>} : memref<16x128xf32, #tpu.memory_space<vmem>>, vector<16x128xf32>,
    return
  }
  func.func @transform_0(%arg0: i32) -> (i32, i32) {
    %c0_i32 = arith.constant 0 : i32
    %c0_i32_0 = arith.constant 0 : i32
    return %arg0, %c0_i32 : i32, i32
  }
  func.func @transform_1(%arg0: i32) -> (i32, i32) {
    %c0_i32 = arith.constant 0 : i32
    %c0_i32_0 = arith.constant 0 : i32
    return %arg0, %c0_i32 : i32, i32
  }
}

</mosaic_0001>

<bundles_post_ra>
// kernel: tpu_custom_call.1
= control target key start
LH: loop header
LB: loop body
LE: loop exit
PB: predicated region body
PF: predicated region fallthrough
CT: control target
= control target key end

     0   :  { %6 = vsyncpa [#allocation3], 0  ;;  %s633_s0 = inlined_call_operand.hbm [shape: f32[16,128], index: 0, kind: input, shape index: {}]   ;;  %s634_s1 = inlined_call_operand.hbm [shape: f32[16,128], index: 1, kind: output, shape index: {}]  }
   0x1   :  { %7 = vsyncpa [#allocation4], 0  ;;  %s12_s8 = sshll.u32 %s633_s0, 4  ;;  %s427_s9 = smov [#allocation2]   ;;  %s13_s8 = int_to_ptr.hbm [resolvable:$true] %s12_s8 }
   0x2   :  { %s14_s10 = sshll.u32 %s427_s9, 4  ;;  %s428_s11 = smov 128   ;;  %s15_s10 = int_to_ptr.vmem [resolvable:$true] %s14_s10 }
   0x3   :  { %s429_s12 = smov 8  }
   0x4   :  { %20 = dma.hbm_to_vmem [thread:$0]  %s13_s8, 256, %s15_s10, [#allocation3], %s428_s11, %s428_s11, %s429_s12  }
   0x5   :  { %423 = dma.done.wait [#allocation3], 256  }
   0x6   :  { %424 = vsyncadd [#allocation3], 4294967040  ;;  %v454_v0 = vld [vmem:[#allocation2] sm:$0xff]  ;;  %v456_v1 = vld [vmem:[#allocation2 + $0x8] sm:$0xff]  ;;  %v430_v23 = vmov 683565275  }
   0x7   :  { %v27_v2 = vand.u32 2147483647, %v454_v0  ;;  %v30_v3 = vand.u32 2139095040, %v454_v0  ;;  %v182_v4 = vand.u32 2147483647, %v456_v1  ;;  %v185_v5 = vand.u32 2139095040, %v456_v1 }
   0x8   :  { %v431_v25 = vmov 2475754826   ;;  %v432_v27 = vmov 2131351028   ;;  %v433_v29 = vmov 2102212464  }
   0x9   :  { %v31_v6 = vshrl.u32 %v30_v3, 23  ;;  %v34_v7 = vand.u32 8388607, %v27_v2  ;;  %v186_v8 = vshrl.u32 %v185_v5, 23  ;;  %v189_v12 = vand.u32 8388607, %v182_v4 }
   0xa   :  { %v434_v31 = vmov 920167782   ;;  %v435_v40 = vmov 1326507024   ;;  %s437_s0 = smov [#allocation5]   ;;  %s345_s16 = sshll.u32 %s634_s1, 4  ;;  %s346_s16 = int_to_ptr.hbm [resolvable:$true] %s345_s16 }
   0xb   :  { %v358_v9 = vadd.s32 4294967169, %v31_v6  ;;  %v35_v10 = vor.u32 8388608, %v34_v7  ;;  %v361_v11 = vadd.s32 4294967169, %v186_v8  ;;  %v190_v17 = vor.u32 8388608, %v189_v12  ;;  %s343_s13 = sshll.u32 %s437_s0, 4  ;;  %s344_s13 = int_to_ptr.vmem [resolvable:$true] %s343_s13 }
   0xd   :  { %v37_v13 = vadd.s32 1, %v358_v9  ;;  %v192_v14 = vadd.s32 1, %v361_v11  ;;  %v466_v16 = vshll.u32 %v35_v10, 8  ;;  %v476_v34 = vshll.u32 %v190_v17, 8 }
   0xf   :  { %vm38_vm0 = vcmp.gt.s32.totalorder %v37_v13, 0  ;;  %vm193_vm1 = vcmp.gt.s32.totalorder %v192_v14, 0  ;;  %v76_v33 = vand.u32 65535, %v466_v16  ;;  %v77_v38 = vshrl.u32 %v466_v16, 16 }
  0x10   :  { %v39_v15 = vsel %vm38_vm0, %v37_v13, 0  ;;  %v194_v19 = vsel %vm193_vm1, %v192_v14, 0 }
  0x11   :  { %v41_v18 = vand.u32 31, %v39_v15  ;;  %v468_v20 = vshrl.u32 %v39_v15, 5  ;;  %v470_v21 = vand.u32 31, %v194_v19  ;;  %v494_v51 = vshrl.u32 %v194_v19, 5 }
  0x13   :  { %v42_v22 = vsub.s32 32, %v41_v18  ;;  %v44_v24 = vshll.u32 %v430_v23, %v41_v18  ;;  %v47_v26 = vshll.u32 %v431_v25, %v41_v18  ;;  %v50_v28 = vshll.u32 %v432_v27, %v41_v18 }
  0x14   :  { %v53_v30 = vshll.u32 %v433_v29, %v41_v18  ;;  %v56_v32 = vshll.u32 %v434_v31, %v41_v18  ;;  %vm59_vm2 = vcmp.lt.s32.totalorder %v468_v20, 1  ;;  %vm62_vm3 = vcmp.lt.s32.totalorder %v468_v20, 4 }
  0x15   :  { %v45_v35 = vshrl.u32 %v431_v25, %v42_v22  ;;  %v48_v36 = vshrl.u32 %v432_v27, %v42_v22  ;;  %v51_v37 = vshrl.u32 %v433_v29, %v42_v22  ;;  %v54_v39 = vshrl.u32 %v434_v31, %v42_v22 }
  0x16   :  { %v57_v41 = vshrl.u32 %v435_v40, %v42_v22  ;;  %v485_v45 = vsub.s32 32, %v470_v21  ;;  %v43_v46 = vshrl.u32 %v430_v23, %v42_v22  ;;  %vm61_vm4 = vcmp.lt.s32.totalorder %v468_v20, 3 }
  0x17   :  { %v46_v42 = vor.u32 %v45_v35, %v44_v24  ;;  %v49_v43 = vor.u32 %v48_v36, %v47_v26  ;;  %v52_v44 = vor.u32 %v51_v37, %v50_v28  ;;  %v55_v47 = vor.u32 %v54_v39, %v53_v30 }
  0x18   :  { %v58_v48 = vor.u32 %v57_v41, %v56_v32  ;;  %vm60_vm5 = vcmp.lt.s32.totalorder %v468_v20, 2  ;;  %v199_v54 = vshll.u32 %v430_v23, %v470_v21  ;;  %v202_v55 = vshll.u32 %v431_v25, %v470_v21 }
  0x19   :  { %v67_v49 = vsel %vm59_vm2, %v46_v42, %v49_v43  ;;  %v71_v50 = vsel %vm59_vm2, %v49_v43, %v52_v44  ;;  %v68_v52 = vsel %vm62_vm3, %v55_v47, 920167782  ;;  %v64_v56 = vsel %vm62_vm3, %v52_v44, 2102212464 }
  0x1a   :  { %v72_v53 = vsel %vm62_vm3, %v58_v48, 1326507024  ;;  %v69_v57 = vsel %vm61_vm4, %v52_v44, %v68_v52  ;;  %v200_v59 = vshrl.u32 %v431_v25, %v485_v45  ;;  %v63_v60 = vsel %vm59_vm2, %v43_v46, %v46_v42 }
  0x1b   :  { %v73_v58 = vsel %vm61_vm4, %v55_v47, %v72_v53  ;;  %v70_v61 = vsel %vm60_vm5, %v67_v49, %v69_v57  ;;  %v203_v63 = vshrl.u32 %v432_v27, %v485_v45  ;;  %v65_v8 = vsel %vm61_vm4, %v49_v43, %v64_v56 }
  0x1c   :  { %v74_v62 = vsel %vm60_vm5, %v71_v50, %v73_v58  ;;  %v100_v6 = vand.u32 65535, %v70_v61  ;;  %v101_v7 = vshrl.u32 %v70_v61, 16  ;;  %v519_v9 = vor.u32 %v200_v59, %v199_v54 }
  0x1d   :  { %v78_v3 = vand.u32 65535, %v74_v62  ;;  %v79_v5 = vshrl.u32 %v74_v62, 16  ;;  %v521_v10 = vor.u32 %v203_v63, %v202_v55  ;;  %v205_v11 = vshll.u32 %v432_v27, %v470_v21 }
  0x1e   :  { %v206_v15 = vshrl.u32 %v433_v29, %v485_v45  ;;  %v102_v18 = vmul.u32 %v100_v6, %v76_v33  ;;  %v103_v19 = vmul.u32 %v101_v7, %v76_v33  ;;  %v104_v22 = vmul.u32 %v100_v6, %v77_v38 }
  0x1f   :  { %v80_v12 = vmul.u32 %v78_v3, %v76_v33  ;;  %v81_v13 = vmul.u32 %v79_v5, %v76_v33  ;;  %v82_v14 = vmul.u32 %v78_v3, %v77_v38  ;;  %v83_v17 = vmul.u32 %v79_v5, %v77_v38 }
  0x20   :  { %v105_v28 = vmul.u32 %v101_v7, %v77_v38  ;;  %v106_v32 = vshll.u32 %v103_v19, 16  ;;  %v107_v35 = vshrl.u32 %v103_v19, 16  ;;  %v108_v36 = vshll.u32 %v104_v22, 16 }
  0x21   :  { %v84_v24 = vshll.u32 %v81_v13, 16  ;;  %v85_v25 = vshrl.u32 %v81_v13, 16  ;;  %v86_v26 = vshll.u32 %v82_v14, 16  ;;  %v87_v30 = vshrl.u32 %v82_v14, 16 }
  0x22   :  { %v109_v37 = vshrl.u32 %v104_v22, 16  ;;  %v208_v39 = vshll.u32 %v433_v29, %v470_v21  ;;  %v436_v41 = vmov 0   ;;  %vm110_vm7 = vc.u32 %v102_v18, %v106_v32 }
  0x23   :  { %vm88_vm6 = vc.u32 %v80_v12, %v84_v24  ;;  %v90_v27 = vadd.s32 %v84_v24, %v80_v12  ;;  %v112_v33 = vadd.s32 %v106_v32, %v102_v18  ;;  %v209_v43 = vshrl.u32 %v434_v31, %v485_v45 }
  0x24   :  { %v89_v42 = vsel %vm88_vm6, 1, %v436_v41  ;;  %v111_v38 = vsel %vm110_vm7, 1, %v436_v41  ;;  %v211_v46 = vshll.u32 %v434_v31, %v470_v21  ;;  %v207_v29 = vor.u32 %v206_v15, %v205_v11 }
  0x25   :  { %v91_v44 = vadd.s32 %v89_v42, %v83_v17  ;;  %vm92_vm8 = vc.u32 %v90_v27, %v86_v26  ;;  %v113_v48 = vadd.s32 %v111_v38, %v105_v28  ;;  %vm114_vm9 = vc.u32 %v112_v33, %v108_v36 }
  0x26   :  { %v93_v47 = vsel %vm92_vm8, 1, %v436_v41  ;;  %v115_v50 = vsel %vm114_vm9, 1, %v436_v41  ;;  %v210_v52 = vor.u32 %v209_v43, %v208_v39  ;;  %v212_v53 = vshrl.u32 %v435_v40, %v485_v45 }
  0x27   :  { %v95_v49 = vadd.s32 %v93_v47, %v91_v44  ;;  %v538_v54 = vadd.s32 %v112_v33, %v108_v36  ;;  %v117_v55 = vadd.s32 %v115_v50, %v113_v48  ;;  %vm214_vm10 = vcmp.lt.s32.totalorder %v494_v51, 1 }
  0x28   :  { %vm216_vm11 = vcmp.lt.s32.totalorder %v494_v51, 3  ;;  %v213_v31 = vor.u32 %v212_v53, %v211_v46  ;;  %vm215_vm12 = vcmp.lt.s32.totalorder %v494_v51, 2  ;;  %vm217_vm13 = vcmp.lt.s32.totalorder %v494_v51, 4 }
  0x29   :  { %v96_v21 = vadd.s32 %v95_v49, %v85_v25  ;;  %v66_v56 = vsel %vm60_vm5, %v63_v60, %v65_v8  ;;  %v118_v57 = vadd.s32 %v117_v55, %v107_v35  ;;  %v222_v40 = vsel %vm214_vm10, %v519_v9, %v521_v10 }
  0x2a   :  { %v223_v58 = vsel %vm217_vm13, %v210_v52, 920167782  ;;  %v226_v62 = vsel %vm214_vm10, %v521_v10, %v207_v29  ;;  %v231_v20 = vand.u32 65535, %v476_v34  ;;  %v227_v3 = vsel %vm217_vm13, %v213_v31, 1326507024 }
  0x2b   :  { %v552_v59 = vadd.s32 %v96_v21, %v87_v30  ;;  %v224_v61 = vsel %vm216_vm11, %v207_v29, %v223_v58  ;;  %v119_v60 = vadd.s32 %v118_v57, %v109_v37  ;;  %v232_v5 = vshrl.u32 %v476_v34, 16 }
  0x2c   :  { %v225_v63 = vsel %vm215_vm12, %v222_v40, %v224_v61  ;;  %v120_v6 = vmul.u32 %v466_v16, %v66_v56  ;;  %v228_v7 = vsel %vm216_vm11, %v210_v52, %v227_v3  ;;  %v198_v18 = vshrl.u32 %v430_v23, %v485_v45 }
  0x2d   :  { %vm122_vm14 = vc.u32 %v552_v59, %v538_v54  ;;  %v255_v8 = vand.u32 65535, %v225_v63  ;;  %v123_v11 = vadd.s32 1, %v119_v60  ;;  %v229_v12 = vsel %vm215_vm12, %v226_v62, %v228_v7 }
  0x2e   :  { %v256_v13 = vshrl.u32 %v225_v63, 16  ;;  %v233_v14 = vand.u32 65535, %v229_v12  ;;  %v234_v15 = vshrl.u32 %v229_v12, 16  ;;  %v219_v35 = vsel %vm217_vm13, %v207_v29, 2102212464 }
  0x2f   :  { %v124_v17 = vsel %vm122_vm14, %v123_v11, %v119_v60  ;;  %v259_v16 = vmul.u32 %v255_v8, %v232_v5  ;;  %v257_v26 = vmul.u32 %v255_v8, %v231_v20  ;;  %v218_v37 = vsel %vm214_vm10, %v198_v18, %v519_v9 }
  0x30   :  { %v258_v19 = vmul.u32 %v256_v13, %v231_v20  ;;  %v125_v22 = vadd.s32 %v124_v17, %v120_v6  ;;  %v235_v24 = vmul.u32 %v233_v14, %v231_v20  ;;  %v236_v25 = vmul.u32 %v234_v15, %v231_v20 }
  0x31   :  { %v237_v28 = vmul.u32 %v233_v14, %v232_v5  ;;  %v238_v36 = vmul.u32 %v234_v15, %v232_v5  ;;  %v260_v23 = vmul.u32 %v256_v13, %v232_v5  ;;  %v263_v45 = vshll.u32 %v259_v16, 16 }
  0x32   :  { %v261_v30 = vshll.u32 %v258_v19, 16  ;;  %v126_v32 = vadd.s32 536870912, %v125_v22  ;;  %v239_v27 = vshll.u32 %v236_v25, 16  ;;  %v220_v43 = vsel %vm216_vm11, %v521_v10, %v219_v35 }
  0x33   :  { %v241_v39 = vshll.u32 %v237_v28, 16  ;;  %v240_v9 = vshrl.u32 %v236_v25, 16  ;;  %v262_v49 = vshrl.u32 %v258_v19, 16  ;;  %v242_v53 = vshrl.u32 %v237_v28, 16 }
  0x34   :  { %v579_v42 = vshrl.u32 %v126_v32, 30  ;;  %vm243_vm15 = vc.u32 %v235_v24, %v239_v27  ;;  %v245_v33 = vadd.s32 %v239_v27, %v235_v24  ;;  %vm265_vm0 = vc.u32 %v257_v26, %v261_v30 }
  0x35   :  { %v244_v44 = vsel %vm243_vm15, 1, %v436_v41  ;;  %v266_v38 = vsel %vm265_vm0, 1, %v436_v41  ;;  %v267_v46 = vadd.s32 %v261_v30, %v257_v26  ;;  %v264_v21 = vshrl.u32 %v259_v16, 16 }
  0x36   :  { %v128_v47 = vshll.u32 %v579_v42, 30  ;;  %v246_v48 = vadd.s32 %v244_v44, %v238_v36  ;;  %vm247_vm1 = vc.u32 %v245_v33, %v241_v39  ;;  %v268_v50 = vadd.s32 %v266_v38, %v260_v23 }
  0x37   :  { %v248_v29 = vsel %vm247_vm1, 1, %v436_v41  ;;  %vm269_vm2 = vc.u32 %v267_v46, %v263_v45  ;;  %v271_v40 = vadd.s32 %v267_v46, %v263_v45  ;;  %v221_v58 = vsel %vm215_vm12, %v218_v37, %v220_v43 }
  0x38   :  { %v129_v52 = vsub.s32 %v125_v22, %v128_v47  ;;  %v250_v55 = vadd.s32 %v248_v29, %v246_v48  ;;  %v270_v10 = vsel %vm269_vm2, 1, %v436_v41  ;;  %v275_v3 = vmul.u32 %v476_v34, %v221_v58 }
  0x39   :  { %v272_v31 = vadd.s32 %v270_v10, %v268_v50  ;;  %v121_v41 = vadd.s32 %v538_v54, %v552_v59  ;;  %v151_v28 = vsub.s32 4, %v579_v42  ;;  %vm29_vm7 = vcmp.lt.s32.totalorder %v454_v0, 0 }
  0x3a   :  { %vm130_vm3 = vcmp.lt.s32.totalorder %v129_v52, 0  ;;  %v131_v56 = vsub.s32 0, %v129_v52  ;;  %v251_v57 = vadd.s32 %v250_v55, %v240_v9  ;;  %vm601_vm8 = vcmp.le.f32.partialorder %v27_v2, 0.7853982 }
  0x3b   :  { %v273_v61 = vadd.s32 %v272_v31, %v262_v49  ;;  %v152_v37 = vsel %vm29_vm7, %v151_v28, %v579_v42  ;;  %vm184_vm11 = vcmp.lt.s32.totalorder %v456_v1, 0  ;;  %vm615_vm13 = vcmp.le.f32.partialorder %v182_v4, 0.7853982 }
  0x3c   :  { %v132_v62 = vsel %vm130_vm3, %v131_v56, %v129_v52  ;;  %v252_v20 = vadd.s32 %v251_v57, %v242_v53  ;;  %v154_v43 = vsel %vm601_vm8, 0, %v152_v37  ;;  %vm170_vm15 = vweird.f32 %v454_v0 }
  0x3d   :  { %v133_v60 = vclz %v132_v62  ;;  %v274_v63 = vadd.s32 %v273_v61, %v264_v21  ;;  %v171_v49 = vadd.s32 3, %v154_v43  ;;  %vm325_vm3 = vweird.f32 %v456_v1 }
  0x3e   :  { %vm277_vm4 = vc.u32 %v252_v20, %v271_v40  ;;  %v276_v33 = vadd.s32 %v271_v40, %v252_v20 }
  0x3f   :  { %v359_v5 = vadd.s32 4294967294, %v133_v60  ;;  %v278_v6 = vadd.s32 1, %v274_v63  ;;  %v172_v56 = vand.u32 3, %v171_v49 }
  0x41   :  { %vm360_vm5 = vcmp.lt.s32.totalorder %v359_v5, 0  ;;  %v279_v7 = vsel %vm277_vm4, %v278_v6, %v274_v63  ;;  %vm177_vm10 = vcmp.eq.s32.totalorder %v172_v56, 2  ;;  %vm174_vm12 = vcmp.eq.s32.totalorder %v172_v56, 0 }
  0x42   :  { %v136_v8 = vsel %vm360_vm5, 0, %v359_v5  ;;  %v280_v11 = vadd.s32 %v279_v7, %v275_v3  ;;  %vm173_vm14 = vcmp.lt.s32.totalorder %v172_v56, 2 }
  0x43   :  { %v137_v12 = vsub.s32 32, %v136_v8  ;;  %v138_v51 = vshll.u32 %v129_v52, %v136_v8  ;;  %v141_v13 = vsub.s32 4294967266, %v136_v8 }
  0x44   :  { %v281_v14 = vadd.s32 536870912, %v280_v11 }
  0x45   :  { %v139_v15 = vshrl.u32 %v121_v41, %v137_v12  ;;  %v142_v17 = vadd.s32 127, %v141_v13 }
  0x46   :  { %v594_v18 = vshrl.u32 %v281_v14, 30 }
  0x47   :  { %v140_v19 = vor.u32 %v139_v15, %v138_v51  ;;  %v143_v34 = vshll.u32 %v142_v17, 23 }
  0x48   :  { %v283_v16 = vshll.u32 %v594_v18, 30  ;;  %v306_v6 = vsub.s32 4, %v594_v18 }
  0x49   :  { %v144_v22 = vor.u32 4788187, %v143_v34  ;;  %v147_v24 = vcvt.s32.f32 %v140_v19 }
  0x4a   :  { %v284_v25 = vsub.s32 %v280_v11, %v283_v16  ;;  %v307_v13 = vsel %vm184_vm11, %v306_v6, %v594_v18 }
  0x4b   :  { %v145_v54 = vand.u32 2147483647, %v144_v22  ;;  %v309_v19 = vsel %vm615_vm13, 0, %v307_v13 }
  0x4c   :  { %vm285_vm6 = vcmp.lt.s32.totalorder %v284_v25, 0  ;;  %v286_v59 = vsub.s32 0, %v284_v25 }
  0x4d   :  { %v148_v26 = vmul.f32 %v147_v24, %v145_v54 }
  0x4e   :  { %v287_v30 = vsel %vm285_vm6, %v286_v59, %v284_v25 }
  0x4f   :  { %v149_v35 = vxor.u32 2147483648, %v148_v26  ;;  %v288_v36 = vclz %v287_v30 }
  0x51   :  { %v150_v27 = vsel %vm29_vm7, %v149_v35, %v148_v26  ;;  %v362_v39 = vadd.s32 4294967294, %v288_v36 }
  0x52   :  { %v153_v23 = vsel %vm601_vm8, %v454_v0, %v150_v27  ;;  %v326_v0 = vadd.s32 3, %v309_v19 }
  0x53   :  { %v155_v45 = vmul.f32 %v153_v23, %v153_v23  ;;  %vm363_vm9 = vcmp.lt.s32.totalorder %v362_v39, 0 }
  0x54   :  { %v291_v2 = vsel %vm363_vm9, 0, %v362_v39  ;;  %v327_v26 = vand.u32 3, %v326_v0 }
  0x55   :  { %v156_v44 = vmul.f32 -0.001358992, %v155_v45  ;;  %v163_v38 = vmul.f32 -0.00019511016, %v155_v45  ;;  %v292_v46 = vsub.s32 32, %v291_v2  ;;  %v293_v47 = vshll.u32 %v284_v25, %v291_v2 }
  0x56   :  { %v296_v9 = vsub.s32 4294967266, %v291_v2  ;;  %vm332_vm0 = vcmp.eq.s32.totalorder %v327_v26, 2  ;;  %vm329_vm1 = vcmp.eq.s32.totalorder %v327_v26, 0  ;;  %vm328_vm2 = vcmp.lt.s32.totalorder %v327_v26, 2 }
  0x57   :  { %v157_v48 = vadd.f32 0.041655596, %v156_v44  ;;  %v164_v29 = vadd.f32 0.008332121, %v163_v38  ;;  %v294_v42 = vshrl.u32 %v276_v33, %v292_v46 }
  0x58   :  { %v297_v50 = vadd.s32 127, %v296_v9 }
  0x59   :  { %v158_v52 = vmul.f32 %v157_v48, %v155_v45  ;;  %v165_v53 = vmul.f32 %v164_v29, %v155_v45  ;;  %v295_v55 = vor.u32 %v294_v42, %v293_v47 }
  0x5a   :  { %v298_v10 = vshll.u32 %v297_v50, 23 }
  0x5b   :  { %v159_v21 = vadd.f32 -0.4999988, %v158_v52  ;;  %v166_v31 = vadd.f32 -0.16666654, %v165_v53  ;;  %v302_v40 = vcvt.s32.f32 %v295_v55 }
  0x5c   :  { %v299_v57 = vor.u32 4788187, %v298_v10 }
  0x5d   :  { %v160_v58 = vmul.f32 %v159_v21, %v155_v45  ;;  %v167_v61 = vmul.f32 %v166_v31, %v155_v45 }
  0x5e   :  { %v300_v62 = vand.u32 2147483647, %v299_v57 }
  0x5f   :  { %v161_v20 = vadd.f32 1.0, %v160_v58  ;;  %v168_v60 = vadd.f32 1.0, %v167_v61 }
  0x60   :  { %v303_v63 = vmul.f32 %v302_v40, %v300_v62 }
  0x61   :  { %v169_v3 = vmul.f32 %v168_v60, %v153_v23  ;;  %v178_v5 = vxor.u32 2147483648, %v161_v20 }
  0x62   :  { %v304_v7 = vxor.u32 2147483648, %v303_v63 }
  0x63   :  { %v175_v8 = vxor.u32 2147483648, %v169_v3  ;;  %v179_v11 = vsel %vm177_vm10, %v178_v5, %v169_v3 }
  0x64   :  { %v305_v12 = vsel %vm184_vm11, %v304_v7, %v303_v63 }
  0x65   :  { %v176_v51 = vsel %vm174_vm12, %v161_v20, %v175_v8  ;;  %v308_v14 = vsel %vm615_vm13, %v456_v1, %v305_v12 }
  0x66   :  { %v180_v15 = vsel %vm173_vm14, %v176_v51, %v179_v11  ;;  %v310_v17 = vmul.f32 %v308_v14, %v308_v14 }
  0x67   :  { %v181_v4 = vsel %vm170_vm15, nan, %v180_v15 }
  0x68   :  { %v311_v34 = vmul.f32 -0.001358992, %v310_v17  ;;  %v318_v16 = vmul.f32 -0.00019511016, %v310_v17  ;;  %337 = vst [vmem:[#allocation5] sm:$0xff] %v181_v4 }
  0x6a   :  { %v312_v22 = vadd.f32 0.041655596, %v311_v34  ;;  %v319_v24 = vadd.f32 0.008332121, %v318_v16 }
  0x6c   :  { %v313_v25 = vmul.f32 %v312_v22, %v310_v17  ;;  %v320_v54 = vmul.f32 %v319_v24, %v310_v17 }
  0x6e   :  { %v314_v59 = vadd.f32 -0.4999988, %v313_v25  ;;  %v321_v18 = vadd.f32 -0.16666654, %v320_v54 }
  0x70   :  { %v315_v28 = vmul.f32 %v314_v59, %v310_v17  ;;  %v322_v30 = vmul.f32 %v321_v18, %v310_v17 }
  0x72   :  { %v316_v32 = vadd.f32 1.0, %v315_v28  ;;  %v323_v35 = vadd.f32 1.0, %v322_v30 }
  0x74   :  { %v324_v36 = vmul.f32 %v323_v35, %v308_v14  ;;  %v333_v27 = vxor.u32 2147483648, %v316_v32 }
  0x76   :  { %v330_v37 = vxor.u32 2147483648, %v324_v36  ;;  %v334_v39 = vsel %vm332_vm0, %v333_v27, %v324_v36 }
  0x78   :  { %v331_v23 = vsel %vm329_vm1, %v316_v32, %v330_v37 }
  0x79   :  { %v335_v45 = vsel %vm328_vm2, %v331_v23, %v334_v39 }
  0x7a   :  { %v336_v33 = vsel %vm325_vm3, nan, %v335_v45 }
  0x7b   :  { %338 = vst [vmem:[#allocation5 + $0x8] sm:$0xff] %v336_v33 }
  0x7c   :  { %351 = dma.vmem_to_hbm [thread:$0]  %s344_s13, 256, %s346_s16, [#allocation4], %s428_s11, %s428_s11, %s429_s12  }
  0x7d   :  { %425 = dma.done.wait [#allocation4], 256  }
  0x7e   :  { %426 = vsyncadd [#allocation4], 4294967040 }
  0x7f   :  { %356 = vsyncpa [#allocation3], 1 }
  0x80   :  { %357 = vsyncpa [#allocation4], 1 }

</bundles_post_ra>
